<compile_context>
chip_gen: v6e
topology: v6e:2x2x1
jax: 0.10.0
libtpu: 0.0.40
codegen_flags: <defaults>
</compile_context>

<pallas_src>
import jax
import jax.numpy as jnp
from jax.experimental import pallas as pl
from jax.experimental.pallas import tpu as pltpu


def clip_embedding_kernel(tokens_smem, table_hbm, pos_ref, out_ref, sems):
    """tokens_smem: (B, S) int32 in SMEM (scalar prefetch)
       table_hbm:   (V, D) f32 raw HBM ref (memory_space=pl.ANY)
       pos_ref:     (S, D) f32 in VMEM
       out_ref:     (TB, S, D) f32 in VMEM (TB batch rows)
       sems:        (TB,) DMA semaphores (one per batch row in the block)"""
    g = pl.program_id(0)
    TB, S, _ = out_ref.shape

    # Phase 1: issue every row gather for all TB batch rows up front so the
    # small per-row DMAs overlap each other.  Row tb's S copies all signal
    # sems[tb]; destinations are disjoint (1, D) slots of the output block.
    # Token ids are read from SMEM only to form DMA addresses; out-of-range
    # ids become OOB DMAs trapped by the default DMA bounds check (matches
    # nn.Embedding's undefined behaviour rather than clamping).
    for tb in range(TB):
        b = g * TB + tb
        for s in range(S):
            tok = tokens_smem[b, s]
            pltpu.make_async_copy(
                table_hbm.at[pl.ds(tok, 1), :],     # (1, D) table row in HBM
                out_ref.at[tb, pl.ds(s, 1), :],     # (1, D) slot of the output
                sems.at[tb],
            ).start()

    # Phase 2: retire one batch row at a time.  A single aggregate wait per
    # row (dst sized (S, D) == total bytes of that row's S gathers) replaces
    # S separate waits; the positional add of row tb overlaps the gathers of
    # rows tb+1.. that are still in flight.
    pos = pos_ref[...]
    for tb in range(TB):
        pltpu.make_async_copy(out_ref.at[tb], out_ref.at[tb], sems.at[tb]).wait()
        out_ref[tb, :, :] = out_ref[tb, :, :] + pos


def _choose_block_batch(B, max_tb=8):
    """Largest divisor of B that is <= max_tb while keeping >= 2 grid steps
    (so the batch axis can be sharded across v7x's two TensorCores)."""
    if B <= 1:
        return 1
    best = 1
    for t in range(1, min(B, max_tb) + 1):
        if B % t == 0 and B // t >= 2:
            best = t
    return best


def clip_embedding(tokens, token_table, pos_embed):
    """tokens: (B, S) int32, token_table: (V, D) f32, pos_embed: (S, D) f32
       -> (B, S, D) f32   (== nn.Embedding(tokens) + position_embedding)"""
    B, S = tokens.shape
    V, D = token_table.shape
    assert pos_embed.shape == (S, D), "seq length must equal n_token"

    TB = _choose_block_batch(B)
    itemsize = jnp.dtype(jnp.float32).itemsize

    # Tiny, memory-bound op: tell XLA what it really costs.
    cost = pl.CostEstimate(
        flops=B * S * D,                                   # the positional add
        transcendentals=0,
        bytes_accessed=2 * B * S * D * itemsize            # gathered rows + out
        + S * D * itemsize                                 # positional embedding
        + B * S * 4,                                       # token ids
    )

    return pl.pallas_call(
        clip_embedding_kernel,
        out_shape=jax.ShapeDtypeStruct((B, S, D), jnp.float32),
        grid_spec=pltpu.PrefetchScalarGridSpec(
            num_scalar_prefetch=1,                  # tokens -> SMEM
            grid=(B // TB,),
            in_specs=[
                pl.BlockSpec(memory_space=pl.ANY),              # table stays in HBM
                pl.BlockSpec((S, D), lambda g, toks: (0, 0)),   # positional embedding
            ],
            out_specs=pl.BlockSpec((TB, S, D), lambda g, toks: (g, 0, 0)),
            scratch_shapes=[
                pltpu.SemaphoreType.DMA((TB,)),     # one sem per batch row in block
            ],
        ),
        compiler_params=pltpu.CompilerParams(
            dimension_semantics=("parallel",),      # shard batch across TCs
        ),
        cost_estimate=cost,
    )(tokens.astype(jnp.int32), token_table, pos_embed)


if __name__ == "__main__":
    # Small shapes consistent with the module: n_vocab=64, n_embed=128, n_token=8.
    # (D=128 keeps the output block lane-dense; real CLIP D=768 also is.)
    n_vocab, n_embed, n_token = 64, 128, 8
    batch, seq = 2, n_token

    key = jax.random.PRNGKey(0)
    k_tok, k_table, k_pos = jax.random.split(key, 3)

    # Deterministic synthetic parameters (nn.Embedding ~ N(0,1); the positional
    # embedding is torch.zeros in __init__, but we use small deterministic
    # values so the '+ position_embedding' path is actually exercised).
    token_table = jax.random.normal(k_table, (n_vocab, n_embed), dtype=jnp.float32)
    pos_embed = 0.01 * jax.random.normal(k_pos, (n_token, n_embed), dtype=jnp.float32)

    tokens = jax.random.randint(k_tok, (batch, seq), 0, n_vocab, dtype=jnp.int32)

    out = clip_embedding(tokens, token_table, pos_embed)
    out = jax.block_until_ready(out)

    # Pure-JAX reference: token_embedding(tokens) + position_embedding
    ref = token_table[tokens] + pos_embed[None, :, :]
    assert out.shape == (batch, seq, n_embed)
    assert jnp.allclose(out, ref, atol=1e-5, rtol=1e-5)

    print("KERNEL_OK")
</pallas_src>

<mosaic_0001>
module attributes {stable_mosaic.version = 11 : i64} {
  func.func @clip_embedding_kernel(%arg0: i32, %arg1: memref<2x8xi32, #tpu.memory_space<smem>>, %arg2: memref<64x128xf32, #tpu.memory_space<any>>, %arg3: memref<8x128xf32, #tpu.memory_space<vmem>>, %arg4: memref<1x8x128xf32, #tpu.memory_space<vmem>>, %arg5: memref<1x!tpu.dma_semaphore, #tpu.memory_space<semaphore_mem>>) attributes {dimension_semantics = [#tpu.dimension_semantics<parallel>], iteration_bounds = array<i64: 2>, scalar_prefetch = 1 : i64, scratch_operands = 1 : i64, tpu.core_type = #tpu.core_type<tc>, window_params = [{}, {pipeline_mode = #tpu.pipeline_mode<synchronous>, transform_indices = @transform_1, window_bounds = array<i64: 8, 128>}, {transform_indices = @transform_2, window_bounds = array<i64: 1, 8, 128>}]} {
    %c1_i32 = arith.constant 1 : i32
    %0 = arith.muli %arg0, %c1_i32 : i32
    %c0_i32 = arith.constant 0 : i32
    %1 = arith.addi %0, %c0_i32 : i32
    %2 = arith.index_cast %1 : i32 to index
    %c0 = arith.constant 0 : index
    %3 = memref.load %arg1[%2, %c0] : memref<2x8xi32, #tpu.memory_space<smem>>
    %c0_i32_0 = arith.constant 0 : i32
    %c0_i32_1 = arith.constant 0 : i32
    %c0_i32_2 = arith.constant 0 : i32
    %4 = tpu.memref_slice %arg2[%3, %c0_i32_2] : memref<64x128xf32, #tpu.memory_space<any>> -> memref<1x128xf32, #tpu.memory_space<any>>
    %c0_i32_3 = arith.constant 0 : i32
    %c0_i32_4 = arith.constant 0 : i32
    %5 = tpu.memref_slice %arg4[%c0_i32_0, %c0_i32_3, %c0_i32_4] : memref<1x8x128xf32, #tpu.memory_space<vmem>> -> memref<1x1x128xf32, #tpu.memory_space<vmem>>
    %6 = tpu.memref_squeeze %5 : memref<1x1x128xf32, #tpu.memory_space<vmem>> -> memref<1x128xf32, #tpu.memory_space<vmem>>
    %7 = tpu.memref_slice %arg5[%c0_i32_1] : memref<1x!tpu.dma_semaphore, #tpu.memory_space<semaphore_mem>> -> memref<1x!tpu.dma_semaphore, #tpu.memory_space<semaphore_mem>>
    %8 = tpu.memref_squeeze %7 : memref<1x!tpu.dma_semaphore, #tpu.memory_space<semaphore_mem>> -> memref<!tpu.dma_semaphore, #tpu.memory_space<semaphore_mem>>
    tpu.enqueue_dma source(%4 : memref<1x128xf32, #tpu.memory_space<any>>) target(%6 : memref<1x128xf32, #tpu.memory_space<vmem>>) target_semaphore(%8 : memref<!tpu.dma_semaphore, #tpu.memory_space<semaphore_mem>>)
    %9 = arith.index_cast %1 : i32 to index
    %c1 = arith.constant 1 : index
    %10 = memref.load %arg1[%9, %c1] : memref<2x8xi32, #tpu.memory_space<smem>>
    %c0_i32_5 = arith.constant 0 : i32
    %c0_i32_6 = arith.constant 0 : i32
    %c0_i32_7 = arith.constant 0 : i32
    %11 = tpu.memref_slice %arg2[%10, %c0_i32_7] : memref<64x128xf32, #tpu.memory_space<any>> -> memref<1x128xf32, #tpu.memory_space<any>>
    %c1_i32_8 = arith.constant 1 : i32
    %c0_i32_9 = arith.constant 0 : i32
    %12 = tpu.memref_slice %arg4[%c0_i32_5, %c1_i32_8, %c0_i32_9] : memref<1x8x128xf32, #tpu.memory_space<vmem>> -> memref<1x1x128xf32, #tpu.memory_space<vmem>>
    %13 = tpu.memref_squeeze %12 : memref<1x1x128xf32, #tpu.memory_space<vmem>> -> memref<1x128xf32, #tpu.memory_space<vmem>>
    %14 = tpu.memref_slice %arg5[%c0_i32_6] : memref<1x!tpu.dma_semaphore, #tpu.memory_space<semaphore_mem>> -> memref<1x!tpu.dma_semaphore, #tpu.memory_space<semaphore_mem>>
    %15 = tpu.memref_squeeze %14 : memref<1x!tpu.dma_semaphore, #tpu.memory_space<semaphore_mem>> -> memref<!tpu.dma_semaphore, #tpu.memory_space<semaphore_mem>>
    tpu.enqueue_dma source(%11 : memref<1x128xf32, #tpu.memory_space<any>>) target(%13 : memref<1x128xf32, #tpu.memory_space<vmem>>) target_semaphore(%15 : memref<!tpu.dma_semaphore, #tpu.memory_space<semaphore_mem>>)
    %16 = arith.index_cast %1 : i32 to index
    %c2 = arith.constant 2 : index
    %17 = memref.load %arg1[%16, %c2] : memref<2x8xi32, #tpu.memory_space<smem>>
    %c0_i32_10 = arith.constant 0 : i32
    %c0_i32_11 = arith.constant 0 : i32
    %c0_i32_12 = arith.constant 0 : i32
    %18 = tpu.memref_slice %arg2[%17, %c0_i32_12] : memref<64x128xf32, #tpu.memory_space<any>> -> memref<1x128xf32, #tpu.memory_space<any>>
    %c2_i32 = arith.constant 2 : i32
    %c0_i32_13 = arith.constant 0 : i32
    %19 = tpu.memref_slice %arg4[%c0_i32_10, %c2_i32, %c0_i32_13] : memref<1x8x128xf32, #tpu.memory_space<vmem>> -> memref<1x1x128xf32, #tpu.memory_space<vmem>>
    %20 = tpu.memref_squeeze %19 : memref<1x1x128xf32, #tpu.memory_space<vmem>> -> memref<1x128xf32, #tpu.memory_space<vmem>>
    %21 = tpu.memref_slice %arg5[%c0_i32_11] : memref<1x!tpu.dma_semaphore, #tpu.memory_space<semaphore_mem>> -> memref<1x!tpu.dma_semaphore, #tpu.memory_space<semaphore_mem>>
    %22 = tpu.memref_squeeze %21 : memref<1x!tpu.dma_semaphore, #tpu.memory_space<semaphore_mem>> -> memref<!tpu.dma_semaphore, #tpu.memory_space<semaphore_mem>>
    tpu.enqueue_dma source(%18 : memref<1x128xf32, #tpu.memory_space<any>>) target(%20 : memref<1x128xf32, #tpu.memory_space<vmem>>) target_semaphore(%22 : memref<!tpu.dma_semaphore, #tpu.memory_space<semaphore_mem>>)
    %23 = arith.index_cast %1 : i32 to index
    %c3 = arith.constant 3 : index
    %24 = memref.load %arg1[%23, %c3] : memref<2x8xi32, #tpu.memory_space<smem>>
    %c0_i32_14 = arith.constant 0 : i32
    %c0_i32_15 = arith.constant 0 : i32
    %c0_i32_16 = arith.constant 0 : i32
    %25 = tpu.memref_slice %arg2[%24, %c0_i32_16] : memref<64x128xf32, #tpu.memory_space<any>> -> memref<1x128xf32, #tpu.memory_space<any>>
    %c3_i32 = arith.constant 3 : i32
    %c0_i32_17 = arith.constant 0 : i32
    %26 = tpu.memref_slice %arg4[%c0_i32_14, %c3_i32, %c0_i32_17] : memref<1x8x128xf32, #tpu.memory_space<vmem>> -> memref<1x1x128xf32, #tpu.memory_space<vmem>>
    %27 = tpu.memref_squeeze %26 : memref<1x1x128xf32, #tpu.memory_space<vmem>> -> memref<1x128xf32, #tpu.memory_space<vmem>>
    %28 = tpu.memref_slice %arg5[%c0_i32_15] : memref<1x!tpu.dma_semaphore, #tpu.memory_space<semaphore_mem>> -> memref<1x!tpu.dma_semaphore, #tpu.memory_space<semaphore_mem>>
    %29 = tpu.memref_squeeze %28 : memref<1x!tpu.dma_semaphore, #tpu.memory_space<semaphore_mem>> -> memref<!tpu.dma_semaphore, #tpu.memory_space<semaphore_mem>>
    tpu.enqueue_dma source(%25 : memref<1x128xf32, #tpu.memory_space<any>>) target(%27 : memref<1x128xf32, #tpu.memory_space<vmem>>) target_semaphore(%29 : memref<!tpu.dma_semaphore, #tpu.memory_space<semaphore_mem>>)
    %30 = arith.index_cast %1 : i32 to index
    %c4 = arith.constant 4 : index
    %31 = memref.load %arg1[%30, %c4] : memref<2x8xi32, #tpu.memory_space<smem>>
    %c0_i32_18 = arith.constant 0 : i32
    %c0_i32_19 = arith.constant 0 : i32
    %c0_i32_20 = arith.constant 0 : i32
    %32 = tpu.memref_slice %arg2[%31, %c0_i32_20] : memref<64x128xf32, #tpu.memory_space<any>> -> memref<1x128xf32, #tpu.memory_space<any>>
    %c4_i32 = arith.constant 4 : i32
    %c0_i32_21 = arith.constant 0 : i32
    %33 = tpu.memref_slice %arg4[%c0_i32_18, %c4_i32, %c0_i32_21] : memref<1x8x128xf32, #tpu.memory_space<vmem>> -> memref<1x1x128xf32, #tpu.memory_space<vmem>>
    %34 = tpu.memref_squeeze %33 : memref<1x1x128xf32, #tpu.memory_space<vmem>> -> memref<1x128xf32, #tpu.memory_space<vmem>>
    %35 = tpu.memref_slice %arg5[%c0_i32_19] : memref<1x!tpu.dma_semaphore, #tpu.memory_space<semaphore_mem>> -> memref<1x!tpu.dma_semaphore, #tpu.memory_space<semaphore_mem>>
    %36 = tpu.memref_squeeze %35 : memref<1x!tpu.dma_semaphore, #tpu.memory_space<semaphore_mem>> -> memref<!tpu.dma_semaphore, #tpu.memory_space<semaphore_mem>>
    tpu.enqueue_dma source(%32 : memref<1x128xf32, #tpu.memory_space<any>>) target(%34 : memref<1x128xf32, #tpu.memory_space<vmem>>) target_semaphore(%36 : memref<!tpu.dma_semaphore, #tpu.memory_space<semaphore_mem>>)
    %37 = arith.index_cast %1 : i32 to index
    %c5 = arith.constant 5 : index
    %38 = memref.load %arg1[%37, %c5] : memref<2x8xi32, #tpu.memory_space<smem>>
    %c0_i32_22 = arith.constant 0 : i32
    %c0_i32_23 = arith.constant 0 : i32
    %c0_i32_24 = arith.constant 0 : i32
    %39 = tpu.memref_slice %arg2[%38, %c0_i32_24] : memref<64x128xf32, #tpu.memory_space<any>> -> memref<1x128xf32, #tpu.memory_space<any>>
    %c5_i32 = arith.constant 5 : i32
    %c0_i32_25 = arith.constant 0 : i32
    %40 = tpu.memref_slice %arg4[%c0_i32_22, %c5_i32, %c0_i32_25] : memref<1x8x128xf32, #tpu.memory_space<vmem>> -> memref<1x1x128xf32, #tpu.memory_space<vmem>>
    %41 = tpu.memref_squeeze %40 : memref<1x1x128xf32, #tpu.memory_space<vmem>> -> memref<1x128xf32, #tpu.memory_space<vmem>>
    %42 = tpu.memref_slice %arg5[%c0_i32_23] : memref<1x!tpu.dma_semaphore, #tpu.memory_space<semaphore_mem>> -> memref<1x!tpu.dma_semaphore, #tpu.memory_space<semaphore_mem>>
    %43 = tpu.memref_squeeze %42 : memref<1x!tpu.dma_semaphore, #tpu.memory_space<semaphore_mem>> -> memref<!tpu.dma_semaphore, #tpu.memory_space<semaphore_mem>>
    tpu.enqueue_dma source(%39 : memref<1x128xf32, #tpu.memory_space<any>>) target(%41 : memref<1x128xf32, #tpu.memory_space<vmem>>) target_semaphore(%43 : memref<!tpu.dma_semaphore, #tpu.memory_space<semaphore_mem>>)
    %44 = arith.index_cast %1 : i32 to index
    %c6 = arith.constant 6 : index
    %45 = memref.load %arg1[%44, %c6] : memref<2x8xi32, #tpu.memory_space<smem>>
    %c0_i32_26 = arith.constant 0 : i32
    %c0_i32_27 = arith.constant 0 : i32
    %c0_i32_28 = arith.constant 0 : i32
    %46 = tpu.memref_slice %arg2[%45, %c0_i32_28] : memref<64x128xf32, #tpu.memory_space<any>> -> memref<1x128xf32, #tpu.memory_space<any>>
    %c6_i32 = arith.constant 6 : i32
    %c0_i32_29 = arith.constant 0 : i32
    %47 = tpu.memref_slice %arg4[%c0_i32_26, %c6_i32, %c0_i32_29] : memref<1x8x128xf32, #tpu.memory_space<vmem>> -> memref<1x1x128xf32, #tpu.memory_space<vmem>>
    %48 = tpu.memref_squeeze %47 : memref<1x1x128xf32, #tpu.memory_space<vmem>> -> memref<1x128xf32, #tpu.memory_space<vmem>>
    %49 = tpu.memref_slice %arg5[%c0_i32_27] : memref<1x!tpu.dma_semaphore, #tpu.memory_space<semaphore_mem>> -> memref<1x!tpu.dma_semaphore, #tpu.memory_space<semaphore_mem>>
    %50 = tpu.memref_squeeze %49 : memref<1x!tpu.dma_semaphore, #tpu.memory_space<semaphore_mem>> -> memref<!tpu.dma_semaphore, #tpu.memory_space<semaphore_mem>>
    tpu.enqueue_dma source(%46 : memref<1x128xf32, #tpu.memory_space<any>>) target(%48 : memref<1x128xf32, #tpu.memory_space<vmem>>) target_semaphore(%50 : memref<!tpu.dma_semaphore, #tpu.memory_space<semaphore_mem>>)
    %51 = arith.index_cast %1 : i32 to index
    %c7 = arith.constant 7 : index
    %52 = memref.load %arg1[%51, %c7] : memref<2x8xi32, #tpu.memory_space<smem>>
    %c0_i32_30 = arith.constant 0 : i32
    %c0_i32_31 = arith.constant 0 : i32
    %c0_i32_32 = arith.constant 0 : i32
    %53 = tpu.memref_slice %arg2[%52, %c0_i32_32] : memref<64x128xf32, #tpu.memory_space<any>> -> memref<1x128xf32, #tpu.memory_space<any>>
    %c7_i32 = arith.constant 7 : i32
    %c0_i32_33 = arith.constant 0 : i32
    %54 = tpu.memref_slice %arg4[%c0_i32_30, %c7_i32, %c0_i32_33] : memref<1x8x128xf32, #tpu.memory_space<vmem>> -> memref<1x1x128xf32, #tpu.memory_space<vmem>>
    %55 = tpu.memref_squeeze %54 : memref<1x1x128xf32, #tpu.memory_space<vmem>> -> memref<1x128xf32, #tpu.memory_space<vmem>>
    %56 = tpu.memref_slice %arg5[%c0_i32_31] : memref<1x!tpu.dma_semaphore, #tpu.memory_space<semaphore_mem>> -> memref<1x!tpu.dma_semaphore, #tpu.memory_space<semaphore_mem>>
    %57 = tpu.memref_squeeze %56 : memref<1x!tpu.dma_semaphore, #tpu.memory_space<semaphore_mem>> -> memref<!tpu.dma_semaphore, #tpu.memory_space<semaphore_mem>>
    tpu.enqueue_dma source(%53 : memref<1x128xf32, #tpu.memory_space<any>>) target(%55 : memref<1x128xf32, #tpu.memory_space<vmem>>) target_semaphore(%57 : memref<!tpu.dma_semaphore, #tpu.memory_space<semaphore_mem>>)
    %c0_34 = arith.constant 0 : index
    %c0_35 = arith.constant 0 : index
    %58 = vector.load %arg3[%c0_34, %c0_35] : memref<8x128xf32, #tpu.memory_space<vmem>>, vector<8x128xf32>
    %c0_i32_36 = arith.constant 0 : i32
    %c0_i32_37 = arith.constant 0 : i32
    %c0_i32_38 = arith.constant 0 : i32
    %c0_i32_39 = arith.constant 0 : i32
    %c0_i32_40 = arith.constant 0 : i32
    %59 = tpu.memref_slice %arg4[%c0_i32_36, %c0_i32_39, %c0_i32_40] : memref<1x8x128xf32, #tpu.memory_space<vmem>> -> memref<1x8x128xf32, #tpu.memory_space<vmem>>
    %60 = tpu.memref_squeeze %59 : memref<1x8x128xf32, #tpu.memory_space<vmem>> -> memref<8x128xf32, #tpu.memory_space<vmem>>
    %c0_i32_41 = arith.constant 0 : i32
    %c0_i32_42 = arith.constant 0 : i32
    %61 = tpu.memref_slice %arg4[%c0_i32_37, %c0_i32_41, %c0_i32_42] : memref<1x8x128xf32, #tpu.memory_space<vmem>> -> memref<1x8x128xf32, #tpu.memory_space<vmem>>
    %62 = tpu.memref_squeeze %61 : memref<1x8x128xf32, #tpu.memory_space<vmem>> -> memref<8x128xf32, #tpu.memory_space<vmem>>
    %63 = tpu.memref_slice %arg5[%c0_i32_38] : memref<1x!tpu.dma_semaphore, #tpu.memory_space<semaphore_mem>> -> memref<1x!tpu.dma_semaphore, #tpu.memory_space<semaphore_mem>>
    %64 = tpu.memref_squeeze %63 : memref<1x!tpu.dma_semaphore, #tpu.memory_space<semaphore_mem>> -> memref<!tpu.dma_semaphore, #tpu.memory_space<semaphore_mem>>
    tpu.wait_dma2 semaphore(%64 : memref<!tpu.dma_semaphore, #tpu.memory_space<semaphore_mem>>) src(%60 : memref<8x128xf32, #tpu.memory_space<vmem>>) dst(%62 : memref<8x128xf32, #tpu.memory_space<vmem>>)
    %c0_43 = arith.constant 0 : index
    %c0_44 = arith.constant 0 : index
    %c0_45 = arith.constant 0 : index
    %65 = vector.load %arg4[%c0_43, %c0_44, %c0_45] : memref<1x8x128xf32, #tpu.memory_space<vmem>>, vector<1x8x128xf32>
    %66 = vector.shape_cast %65 : vector<1x8x128xf32> to vector<8x128xf32>
    %67 = arith.addf %66, %58 : vector<8x128xf32>
    %c0_46 = arith.constant 0 : index
    %c0_47 = arith.constant 0 : index
    %c0_48 = arith.constant 0 : index
    %68 = vector.load %arg4[%c0_46, %c0_47, %c0_48] : memref<1x8x128xf32, #tpu.memory_space<vmem>>, vector<1x8x128xf32>
    %69 = vector.shape_cast %68 : vector<1x8x128xf32> to vector<8x128xf32>
    %70 = vector.shape_cast %67 : vector<8x128xf32> to vector<1x8x128xf32>
    tpu.vector_store %arg4[%c0_46, %c0_47, %c0_48], %70 {strides = array<i32>} : memref<1x8x128xf32, #tpu.memory_space<vmem>>, vector<1x8x128xf32>,
    return
  }
  func.func @transform_1(%arg0: i32, %arg1: memref<2x8xi32, #tpu.memory_space<smem>>) -> (i32, i32) {
    %c0_i32 = arith.constant 0 : i32
    %c0_i32_0 = arith.constant 0 : i32
    %c0_i32_1 = arith.constant 0 : i32
    return %c0_i32, %c0_i32_0 : i32, i32
  }
  func.func @transform_2(%arg0: i32, %arg1: memref<2x8xi32, #tpu.memory_space<smem>>) -> (i32, i32, i32) {
    %c0_i32 = arith.constant 0 : i32
    %c0_i32_0 = arith.constant 0 : i32
    %c0_i32_1 = arith.constant 0 : i32
    return %arg0, %c0_i32, %c0_i32_0 : i32, i32, i32
  }
}

</mosaic_0001>

<bundles_post_ra>
// kernel: tpu_custom_call.1
= control target key start
LH: loop header
LB: loop body
LE: loop exit
PB: predicated region body
PF: predicated region fallthrough
CT: control target
= control target key end

     0   :  { %s694_s12 = smov [#allocation4]   ;;  %s972_s0 = inlined_call_operand.hbm [shape: s32[2,8], index: 0, kind: input, shape index: {}]   ;;  %s973_s1 = inlined_call_operand.hbm [shape: f32[64,128], index: 1, kind: input, shape index: {}]   ;;  %s974_s2 = inlined_call_operand.hbm [shape: f32[8,128], index: 2, kind: input, shape index: {}]   ;;  %s975_s3 = inlined_call_operand.hbm [shape: f32[2,8,128], index: 3, kind: output, shape index: {}]  }
   0x1   :  { %978 = sst [smem:[#allocation33_spill]] %s974_s2 }
   0x2   :  { %9 = dma.hbm_to_smem %s972_s0, 32, %s694_s12, [#allocation3] }
   0x3   :  { %666 = dma.done.wait [#allocation3], 32 }
   0x4   :  { %667 = vsyncadd [#allocation3], 4294967264 }
   0x5   :  { %11 = sfence }
   0x6   :  { %12 = vsyncpa [#allocation6], 0 }
   0x7   :  { %13 = vsyncpa [#allocation7], 0 }
   0x8   :  { %15 = vsyncpa [#allocation7 + $0x1], 0  ;;  %s720_s15 = smov 0   ;;  %s722_s16 = smov 0  }
   0x9   :  { %s724_s17 = smov 0   ;;  %s726_s18 = smov 0  }
   0xa LB: > { %979 = sst [smem:[#allocation31_spill]] %s688_s17  ;;  %s741_s0 = sadd.s32 4294967295, %s692_s18   ;;  %s692_s18 = sphi %s726_s18, %s991_s18   ;;  %s688_s17 = sphi %s724_s17, %s988_s17   ;;  %s684_s16 = sphi %s722_s16, %s990_s16   ;;  %s680_s15 = sphi %s720_s15, %s989_s15  }
   0xb   : > { %s343_s19 = sadd.s32 4294967294, %s692_s18   ;;  %s745_s20 = sadd.s32 1, %s692_s18  }
   0xc   : > { %s49_s21 = sadd.s32 1, %s688_s17  ;;  %s46_s22 = ssub.s32 %s692_s18, %s745_s20 }
   0xd   : > { %p59_p0 = scmp.ne.s32.totalorder %s688_s17, %s684_s16  ;;  %p47_p1 = scmp.eq.s32.totalorder %s46_s22, 0 }
   0xe   : > { %p60_p2 = scmp.eq.s32.totalorder %s741_s0, 1  ;;  %p65_p3 = scmp.ne.s32.totalorder %s684_s16, %s680_s15 }
   0xf   : > { %p66_p4 = scmp.eq.s32.totalorder %s343_s19, 1  ;;  %p344_p7 = scmp.ge.s32.totalorder %s692_s18, 1 }
  0x10   : > { %s756_s23 = scalar_select %p47_p1, %s688_s17, %s49_s21  }
  0x11   : > { %p758_p5 = por %p60_p2, %p59_p0  ;;  %p762_p6 = por %p66_p4, %p65_p3 }
  0x12   : > { %980 = sst [smem:[#allocation32_spill]] %s756_s23  ;;  %p73_p8 = scmp.lt.s32.totalorder %s692_s18, 3 }
  0x13   : > { %s982_s25 = scalar_select %p762_p6, 1, 0 }
  0x14   : > { %p377_p9 = scmp.eq.s32.totalorder %s741_s0, 0  ;;  %p769_p10 = pnand %p344_p7, %p73_p8 }
  0x15   : > { %s695_s27 = smov [#allocation5]  }
  0x16   : > { %s86_s28 = sshll.u32 %s695_s27, 4  ;;  %p369_p11 = pneg %p769_p10  ;;  %s87_s28 = int_to_ptr.vmem [resolvable:$true] %s86_s28 }
  0x17   : > { %s433_s29 = scalar_lea.vmem %s87_s28, 128  ;;  %p441_p3 = scmp.lt.s32.totalorder %s87_s28, %s87_s28 }
  0x18   : > { %p370_p12 = pnand %p377_p9, %p369_p11  ;;  %p434_p0 = scmp.ne.s32.totalorder %s87_s28, %s433_s29 }
  0x19   : > { %p442_p4 = scmp.lt.s32.totalorder %s433_s29, %s433_s29 }
  0x1a   : > { %p424_p13 = pneg %p370_p12 }
  0x1b   : > { %p443_p6 = por %p442_p4, %p441_p3 }
  0x1c   : > { %p436_p1 = pnand %p434_p0, %p424_p13 }
  0x1e   : > { %p437_p2 = pneg %p436_p1 }
  0x20   : > { %p444_p7 = pnand %p443_p6, %p437_p2 }
  0x22   : > { %447 = shalt.err (!%p444_p7)
}
  0x23   : > { %s984_s2 = sld [smem:[#allocation33_spill]] }
  0x25   : > { %99 = sbr.rel (%p769_p10) target bundleno = 233 (0xe9), region = 24 }
  0x29   : > { %372 = dma.hbm_to_vmem [thread:$0]  (!%p370_p12), %s984_s2, 128, %s87_s28, [#allocation6]  }
  0x2a   : > { %669 = dma.done.wait (%p377_p9), [#allocation6], 128  }
  0x2b   : > { %671 = vsyncadd (%p377_p9), [#allocation6], 4294967168  ;;  %s976_s5 = sand.u32 1, %s684_s16   ;;  %s788_s6 = sshll.u32 %s741_s0, 7  ;;  %v807_v0 = vld [vmem:[#allocation5] sm:$0xff] }
  0x2c   : > { %s348_s7 = sshll.u32 %s976_s5, 3  ;;  %s115_s8 = sld [smem:[#allocation4 + %s788_s6]] }
  0x2d   : > { %s129_s9 = sadd.s32 1, %s788_s6  ;;  %s794_s10 = scalar_lea.vmem [#allocation8], %s348_s7 }
  0x2e   : > { %s125_s11 = sshll.u32 %s794_s10, 4  ;;  %s797_s12 = sld [smem:[#allocation4 + %s129_s9]]  ;;  %s799_s11 = int_to_ptr.vmem [resolvable:$true] %s125_s11 }
  0x2f   : > { %s133_s13 = scalar_lea.vmem %s794_s10, 1 [#allocation8]  ;;  %s145_s0 = sadd.s32 2, %s788_s6 }
  0x30   : > { %s141_s14 = sshll.u32 %s133_s13, 4  ;;  %s805_s19 = sld [smem:[#allocation4 + %s145_s0]]  ;;  %s803_s14 = int_to_ptr.vmem [resolvable:$true] %s141_s14 }
  0x31   : > { %s149_s22 = scalar_lea.vmem %s794_s10, 2 [#allocation8]  ;;  %s816_s9 = scalar_lea.hbm %s973_s1, 1024 }
  0x32   : > { %s350_s21 = sshll.u32 %s115_s8, 4  ;;  %s157_s29 = sshll.u32 %s149_s22, 4  ;;  %s837_s29 = int_to_ptr.vmem [resolvable:$true] %s157_s29 }
  0x33   : > { %s117_s28 = scalar_lea.hbm %s973_s1, %s350_s21 }
  0x34   : > { %s448_s30 = scalar_lea.hbm %s117_s28, 16  ;;  %p451_p8 = scmp.lt.s32.totalorder %s117_s28, %s973_s1 }
  0x35   : > { %p449_p6 = scmp.ne.s32.totalorder %s117_s28, %s448_s30  ;;  %p452_p9 = scmp.lt.s32.totalorder %s816_s9, %s448_s30 }
  0x37   : > { %p453_p10 = por %p452_p9, %p451_p8 }
  0x39   : > { %p454_p11 = pnand %p453_p10, %p449_p6 }
  0x3b   : > { %457 = shalt.err (!%p454_p11)  }
  0x3c   : > { %s458_s8 = scalar_lea.vmem %s799_s11, 16  ;;  %s696_s0 = smov [#allocation8]  }
  0x3d   : > { %p459_p12 = scmp.ne.s32.totalorder %s799_s11, %s458_s8  ;;  %s460_s21 = sshll.u32 %s696_s0, 4  ;;  %s824_s21 = int_to_ptr.vmem [resolvable:$false] %s460_s21 }
  0x3e   : > { %s827_s5 = scalar_lea.vmem %s824_s21, 256  ;;  %p463_p13 = scmp.lt.s32.totalorder %s799_s11, %s824_s21 }
  0x3f   : > { %p464_p0 = scmp.lt.s32.totalorder %s827_s5, %s458_s8 }
  0x41   : > { %p465_p1 = por %p464_p0, %p463_p13 }
  0x43   : > { %p466_p2 = pnand %p465_p1, %p459_p12 }
  0x45   : > { %469 = shalt.err (!%p466_p2)  }
  0x46   : > { %128 = dma.hbm_to_vmem [thread:$0]  %s117_s28, 16, %s799_s11, [#allocation2] }
  0x47   : > { %s351_s22 = sshll.u32 %s797_s12, 4  ;;  %s161_s4 = sadd.s32 3, %s788_s6 }
  0x48   : > { %s132_s30 = scalar_lea.hbm %s973_s1, %s351_s22 }
  0x49   : > { %s470_s7 = scalar_lea.hbm %s132_s30, 16  ;;  %p473_p4 = scmp.lt.s32.totalorder %s132_s30, %s973_s1 }
  0x4a   : > { %p471_p3 = scmp.ne.s32.totalorder %s132_s30, %s470_s7  ;;  %p474_p7 = scmp.lt.s32.totalorder %s816_s9, %s470_s7 }
  0x4c   : > { %p475_p6 = por %p474_p7, %p473_p4 }
  0x4e   : > { %p476_p8 = pnand %p475_p6, %p471_p3 }
  0x50   : > { %479 = shalt.err (!%p476_p8)  }
  0x51   : > { %s480_s12 = scalar_lea.vmem %s803_s14, 16  ;;  %p485_p10 = scmp.lt.s32.totalorder %s803_s14, %s824_s21 }
  0x52   : > { %p481_p9 = scmp.ne.s32.totalorder %s803_s14, %s480_s12  ;;  %p486_p11 = scmp.lt.s32.totalorder %s827_s5, %s480_s12 }
  0x54   : > { %p487_p12 = por %p486_p11, %p485_p10 }
  0x56   : > { %p488_p0 = pnand %p487_p12, %p481_p9 }
  0x58   : > { %491 = shalt.err (!%p488_p0)  }
  0x59   : > { %144 = dma.hbm_to_vmem [thread:$0]  %s132_s30, 16, %s803_s14, [#allocation2] }
  0x5a   : > { %s352_s28 = sshll.u32 %s805_s19, 4  ;;  %s162_s0 = sld [smem:[#allocation4 + %s161_s4]] }
  0x5b   : > { %s148_s27 = scalar_lea.hbm %s973_s1, %s352_s28  ;;  %s165_s7 = scalar_lea.vmem %s794_s10, 3 [#allocation8] }
  0x5c   : > { %s492_s13 = scalar_lea.hbm %s148_s27, 16  ;;  %p495_p2 = scmp.lt.s32.totalorder %s148_s27, %s973_s1 }
  0x5d   : > { %p493_p1 = scmp.ne.s32.totalorder %s148_s27, %s492_s13  ;;  %p496_p3 = scmp.lt.s32.totalorder %s816_s9, %s492_s13 }
  0x5f   : > { %p497_p4 = por %p496_p3, %p495_p2 }
  0x61   : > { %p498_p7 = pnand %p497_p4, %p493_p1 }
  0x63   : > { %501 = shalt.err (!%p498_p7)  }
  0x64   : > { %s502_s14 = scalar_lea.vmem %s837_s29, 16  ;;  %p507_p8 = scmp.lt.s32.totalorder %s837_s29, %s824_s21 }
  0x65   : > { %p503_p6 = scmp.ne.s32.totalorder %s837_s29, %s502_s14  ;;  %p508_p9 = scmp.lt.s32.totalorder %s827_s5, %s502_s14 }
  0x67   : > { %p509_p10 = por %p508_p9, %p507_p8 }
  0x69   : > { %p510_p11 = pnand %p509_p10, %p503_p6 }
  0x6b   : > { %513 = shalt.err (!%p510_p11)  }
  0x6c   : > { %160 = dma.hbm_to_vmem [thread:$0]  %s148_s27, 16, %s837_s29, [#allocation2] }
  0x6d   : > { %s173_s2 = sshll.u32 %s165_s7, 4  ;;  %s177_s19 = sadd.s32 4, %s788_s6  ;;  %s174_s2 = int_to_ptr.vmem [resolvable:$true] %s173_s2 }
  0x6e   : > { %s178_s30 = sld [smem:[#allocation4 + %s177_s19]]  ;;  %s181_s4 = scalar_lea.vmem %s794_s10, 4 [#allocation8] }
  0x6f   : > { %s193_s12 = sadd.s32 5, %s788_s6  ;;  %s353_s28 = sshll.u32 %s162_s0, 4 }
  0x70   : > { %s189_s22 = sshll.u32 %s181_s4, 4  ;;  %s164_s8 = scalar_lea.hbm %s973_s1, %s353_s28  ;;  %s874_s22 = int_to_ptr.vmem [resolvable:$true] %s189_s22 }
  0x71   : > { %s514_s14 = scalar_lea.hbm %s164_s8, 16  ;;  %p517_p0 = scmp.lt.s32.totalorder %s164_s8, %s973_s1 }
  0x72   : > { %p515_p12 = scmp.ne.s32.totalorder %s164_s8, %s514_s14  ;;  %p518_p1 = scmp.lt.s32.totalorder %s816_s9, %s514_s14 }
  0x74   : > { %p519_p2 = por %p518_p1, %p517_p0 }
  0x76   : > { %p520_p3 = pnand %p519_p2, %p515_p12 }
  0x78   : > { %523 = shalt.err (!%p520_p3)  }
  0x79   : > { %s524_s29 = scalar_lea.vmem %s174_s2, 16  ;;  %p529_p7 = scmp.lt.s32.totalorder %s174_s2, %s824_s21 }
  0x7a   : > { %p525_p4 = scmp.ne.s32.totalorder %s174_s2, %s524_s29  ;;  %p530_p6 = scmp.lt.s32.totalorder %s827_s5, %s524_s29 }
  0x7c   : > { %p531_p8 = por %p530_p6, %p529_p7 }
  0x7e   : > { %p532_p9 = pnand %p531_p8, %p525_p4 }
  0x80   : > { %535 = shalt.err (!%p532_p9)  }
  0x81   : > { %176 = dma.hbm_to_vmem [thread:$0]  %s164_s8, 16, %s174_s2, [#allocation2] }
  0x82   : > { %s194_s0 = sld [smem:[#allocation4 + %s193_s12]]  ;;  %s197_s27 = scalar_lea.vmem %s794_s10, 5 [#allocation8] }
  0x83   : > { %s354_s17 = sshll.u32 %s178_s30, 4  ;;  %s205_s4 = sshll.u32 %s197_s27, 4  ;;  %s206_s4 = int_to_ptr.vmem [resolvable:$true] %s205_s4 }
  0x84   : > { %s180_s19 = scalar_lea.hbm %s973_s1, %s354_s17 }
  0x85   : > { %s536_s28 = scalar_lea.hbm %s180_s19, 16  ;;  %p539_p11 = scmp.lt.s32.totalorder %s180_s19, %s973_s1 }
  0x86   : > { %p537_p10 = scmp.ne.s32.totalorder %s180_s19, %s536_s28  ;;  %p540_p12 = scmp.lt.s32.totalorder %s816_s9, %s536_s28 }
  0x88   : > { %p541_p0 = por %p540_p12, %p539_p11 }
  0x8a   : > { %p542_p1 = pnand %p541_p0, %p537_p10 }
  0x8c   : > { %545 = shalt.err (!%p542_p1)  }
  0x8d   : > { %s546_s2 = scalar_lea.vmem %s874_s22, 16  ;;  %p551_p3 = scmp.lt.s32.totalorder %s874_s22, %s824_s21 }
  0x8e   : > { %p547_p2 = scmp.ne.s32.totalorder %s874_s22, %s546_s2  ;;  %p552_p4 = scmp.lt.s32.totalorder %s827_s5, %s546_s2 }
  0x90   : > { %p553_p7 = por %p552_p4, %p551_p3 }
  0x92   : > { %p554_p6 = pnand %p553_p7, %p547_p2 }
  0x94   : > { %557 = shalt.err (!%p554_p6)  }
  0x95   : > { %192 = dma.hbm_to_vmem [thread:$0]  %s180_s19, 16, %s874_s22, [#allocation2] }
  0x96   : > { %s209_s30 = sadd.s32 6, %s788_s6  ;;  %s213_s12 = scalar_lea.vmem %s794_s10, 6 [#allocation8] }
  0x97   : > { %s210_s8 = sld [smem:[#allocation4 + %s209_s30]]  ;;  %s355_s14 = sshll.u32 %s194_s0, 4 }
  0x98   : > { %s221_s29 = sshll.u32 %s213_s12, 4  ;;  %s196_s23 = scalar_lea.hbm %s973_s1, %s355_s14  ;;  %s222_s29 = int_to_ptr.vmem [resolvable:$true] %s221_s29 }
  0x99   : > { %s225_s7 = sadd.s32 7, %s788_s6  ;;  %s558_s28 = scalar_lea.hbm %s196_s23, 16 }
  0x9a   : > { %p559_p8 = scmp.ne.s32.totalorder %s196_s23, %s558_s28  ;;  %p561_p9 = scmp.lt.s32.totalorder %s196_s23, %s973_s1 }
  0x9b   : > { %p562_p10 = scmp.lt.s32.totalorder %s816_s9, %s558_s28 }
  0x9d   : > { %p563_p11 = por %p562_p10, %p561_p9 }
  0x9f   : > { %p564_p12 = pnand %p563_p11, %p559_p8 }
  0xa1   : > { %567 = shalt.err (!%p564_p12)  }
  0xa2   : > { %s568_s22 = scalar_lea.vmem %s206_s4, 16  ;;  %p573_p1 = scmp.lt.s32.totalorder %s206_s4, %s824_s21 }
  0xa3   : > { %p569_p0 = scmp.ne.s32.totalorder %s206_s4, %s568_s22  ;;  %p574_p2 = scmp.lt.s32.totalorder %s827_s5, %s568_s22 }
  0xa5   : > { %p575_p3 = por %p574_p2, %p573_p1 }
  0xa7   : > { %p576_p4 = pnand %p575_p3, %p569_p0 }
  0xa9   : > { %579 = shalt.err (!%p576_p4)  }
  0xaa   : > { %208 = dma.hbm_to_vmem [thread:$0]  %s196_s23, 16, %s206_s4, [#allocation2] }
  0xab   : > { %s226_s0 = sld [smem:[#allocation4 + %s225_s7]]  ;;  %s229_s19 = scalar_lea.vmem %s794_s10, 7 [#allocation8] }
  0xac   : > { %s356_s2 = sshll.u32 %s210_s8, 4  ;;  %s237_s30 = sshll.u32 %s229_s19, 4  ;;  %s238_s30 = int_to_ptr.vmem [resolvable:$true] %s237_s30 }
  0xad   : > { %s212_s27 = scalar_lea.hbm %s973_s1, %s356_s2 }
  0xae   : > { %s580_s17 = scalar_lea.hbm %s212_s27, 16  ;;  %p583_p6 = scmp.lt.s32.totalorder %s212_s27, %s973_s1 }
  0xaf   : > { %p581_p7 = scmp.ne.s32.totalorder %s212_s27, %s580_s17  ;;  %p584_p8 = scmp.lt.s32.totalorder %s816_s9, %s580_s17 }
  0xb1   : > { %p585_p9 = por %p584_p8, %p583_p6 }
  0xb3   : > { %p586_p10 = pnand %p585_p9, %p581_p7 }
  0xb5   : > { %589 = shalt.err (!%p586_p10)  }
  0xb6   : > { %s590_s4 = scalar_lea.vmem %s222_s29, 16  ;;  %p595_p12 = scmp.lt.s32.totalorder %s222_s29, %s824_s21 }
  0xb7   : > { %p591_p11 = scmp.ne.s32.totalorder %s222_s29, %s590_s4  ;;  %p596_p0 = scmp.lt.s32.totalorder %s827_s5, %s590_s4 }
  0xb9   : > { %p597_p1 = por %p596_p0, %p595_p12 }
  0xbb   : > { %p598_p2 = pnand %p597_p1, %p591_p11 }
  0xbd   : > { %601 = shalt.err (!%p598_p2)  }
  0xbe   : > { %224 = dma.hbm_to_vmem [thread:$0]  %s212_s27, 16, %s222_s29, [#allocation2] }
  0xbf   : > { %s357_s8 = sshll.u32 %s226_s0, 4 }
  0xc0   : > { %s228_s13 = scalar_lea.hbm %s973_s1, %s357_s8 }
  0xc1   : > { %s602_s22 = scalar_lea.hbm %s228_s13, 16  ;;  %p605_p4 = scmp.lt.s32.totalorder %s228_s13, %s973_s1 }
  0xc2   : > { %p603_p3 = scmp.ne.s32.totalorder %s228_s13, %s602_s22  ;;  %p606_p7 = scmp.lt.s32.totalorder %s816_s9, %s602_s22 }
  0xc4   : > { %p607_p6 = por %p606_p7, %p605_p4 }
  0xc6   : > { %p608_p8 = pnand %p607_p6, %p603_p3 }
  0xc8   : > { %611 = shalt.err (!%p608_p8)  }
  0xc9   : > { %s612_s12 = scalar_lea.vmem %s238_s30, 16  ;;  %p617_p10 = scmp.lt.s32.totalorder %s238_s30, %s824_s21 }
  0xca   : > { %p613_p9 = scmp.ne.s32.totalorder %s238_s30, %s612_s12  ;;  %p618_p11 = scmp.lt.s32.totalorder %s827_s5, %s612_s12 }
  0xcc   : > { %p619_p12 = por %p618_p11, %p617_p10 }
  0xce   : > { %p620_p0 = pnand %p619_p12, %p613_p9 }
  0xd0   : > { %623 = shalt.err (!%p620_p0)  }
  0xd1   : > { %240 = dma.hbm_to_vmem [thread:$0]  %s228_s13, 16, %s238_s30, [#allocation2] }
  0xd2   : > { %672 = dma.done.wait [#allocation2], 128 }
  0xd3   : > { %673 = vsyncadd [#allocation2], 4294967168  ;;  %v245_v1 = vld [vmem:[%s794_s10] sm:$0xff]  ;;  %s260_s0 = scalar_lea.hbm %s975_s3, %s788_s6  ;;  %s985_s30 = sand.u32 1, %s684_s16  }
  0xd4   : > { %v246_v2 = vadd.f32 %v245_v1, %v807_v0  ;;  %s249_s14 = scalar_lea.sflag [#allocation7], %s985_s30  ;;  %s624_s27 = scalar_lea.vmem %s799_s11, 128 }
  0xd5   : > { %p625_p1 = scmp.ne.s32.totalorder %s799_s11, %s624_s27  ;;  %p632_p4 = scmp.lt.s32.totalorder %s827_s5, %s624_s27 }
  0xd6   : > { %247 = vst [vmem:[%s794_s10] sm:$0xff] %v246_v2 }
  0xd7   : > { %p626_p2 = pnand %p625_p1, %p758_p5  ;;  %p633_p7 = por %p632_p4, %p463_p13 }
  0xd9   : > { %p627_p3 = pneg %p626_p2 }
  0xdb   : > { %p634_p6 = pnand %p633_p7, %p627_p3 }
  0xdd   : > { %637 = shalt.err (!%p634_p6)
}
  0xde   : > { %s638_s17 = scalar_lea.hbm %s260_s0, 128  ;;  %s642_s28 = scalar_lea.hbm %s975_s3, 256 }
  0xdf   : > { %p639_p8 = scmp.ne.s32.totalorder %s260_s0, %s638_s17  ;;  %p643_p11 = scmp.lt.s32.totalorder %s260_s0, %s975_s3 }
  0xe0   : > { %p644_p12 = scmp.lt.s32.totalorder %s642_s28, %s638_s17 }
  0xe1   : > { %p640_p9 = pnand %p639_p8, %p758_p5 }
  0xe2   : > { %p645_p0 = por %p644_p12, %p643_p11 }
  0xe3   : > { %p641_p10 = pneg %p640_p9 }
  0xe5   : > { %p646_p1 = pnand %p645_p0, %p641_p10 }
  0xe7   : > { %649 = shalt.err (!%p646_p1)
}
  0xe8   : > { %367 = dma.vmem_to_hbm [thread:$0]  (%p758_p5), %s799_s11, 128, %s260_s0, %s249_s14  }
  0xe9 PF: > { %p379_p13 = scmp.ge.s32.totalorder %s692_s18, 2  ;;  %s274_s21 = sand.u32 1, %s680_s15  }
  0xea   : > { %p986_p2 = scmp.ne.s32.totalorder %s982_s25, 0  ;;  %s275_s5 = scalar_lea.sflag [#allocation7], %s274_s21 }
  0xec   : > { %p374_p3 = pnand %p379_p13, %p986_p2 }
  0xee   : > { %p375_p4 = pneg %p374_p3 }
  0xf0   : > { %675 = dma.done.wait (%p375_p4), %s275_s5, 128  }
  0xf1   : > { %677 = vsyncadd (%p375_p4), %s275_s5, 4294967168  ;;  %s987_s8 = sld [smem:[#allocation31_spill]]  ;;  %p18_p7 = scmp.ge.s32.totalorder %s745_s20, 4  }
  0xf2   : > { %s988_s17 = sld [smem:[#allocation32_spill]]  ;;  %s989_s15 = smov %s684_s16 }
  0xf3   : > { %s991_s18 = smov %s745_s20  ;;  %20 = sbr.rel (!%p18_p7) target bundleno = 10 (0xa), region = 108 }
  0xf7   : > { %s990_s16 = smov %s987_s8 }
  0xf8   :  { %280 = vsyncpa [#allocation6], 1 }
  0xf9   :  { %282 = vsyncpa [#allocation6 + $0x1], 1 }
  0xfa   :  { %283 = vsyncpa [#allocation7], 1 }
  0xfb   :  { %285 = vsyncpa [#allocation7 + $0x1], 1 }
  0xfc   :  { %286 = vsyncmov [#allocation2] }
  0xff   :  { %s287_s18 = vpop.sfrf %286 }
 0x100   :  { %p362_p5 = scmp.ne.s32.totalorder %s287_s18, 0 }
 0x102   :  { %291 = shalt.err (%p362_p5)  }

</bundles_post_ra>
